<compile_context>
chip_gen: v6e
topology: v6e:2x2x1
jax: 0.10.0
libtpu: 0.0.40
codegen_flags: <defaults>
</compile_context>

<pallas_src>
import functools

import jax
import jax.numpy as jnp
from jax.experimental import pallas as pl
from jax.experimental.pallas import tpu as pltpu

_LANE = 128        # lane width of a vreg (last dim)
_SUBLANE_BF16 = 16  # bf16 packs 16 rows per vreg sublane group


def _round_up(n, m):
    return (n + m - 1) // m * m


def _fused_mlp_kernel(*refs, n_linear, batch, in_dim, out_dim):
    """refs = (x, w1, b1, ..., wn, bn, out, xpad_scratch).

    x: f32 [batch, in_dim] (raw, unpadded)
    w_i: bf16 [in_pad_i, out_pad_i] (pre-transposed, zero-padded)
    b_i: f32 [1, out_pad_i]
    out: f32 [batch, out_dim] (raw, unpadded)
    xpad_scratch: f32 [B_pad, in_pad] VMEM scratch
    """
    x_ref = refs[0]
    wb_refs = refs[1:1 + 2 * n_linear]
    o_ref = refs[1 + 2 * n_linear]
    xpad_ref = refs[2 + 2 * n_linear]

    # In-kernel zero-pad of the activations (keeps pad/slice out of the XLA graph).
    # Padded batch rows see bias/ReLU garbage downstream but are sliced off before the store.
    xpad_ref[...] = jnp.zeros_like(xpad_ref)
    xpad_ref[0:batch, 0:in_dim] = x_ref[...]

    h = xpad_ref[...].astype(jnp.bfloat16)           # bf16 feed for the MXU
    for i in range(n_linear):
        w = wb_refs[2 * i][...]                       # bf16 [in_pad, out_pad]
        b = wb_refs[2 * i + 1][...]                   # f32  [1, out_pad]
        # MXU matmul: bf16 inputs, f32 accumulation; epilogue (bias + ReLU) in f32.
        y = jnp.dot(h, w, preferred_element_type=jnp.float32) + b
        if i < n_linear - 1:
            y = jnp.maximum(y, 0.0)                   # ReLU (f32 epilogue, v5e-safe)
            # Dropout: identity at inference time.
            h = y.astype(jnp.bfloat16)
        else:
            # Write exactly the (batch, out_dim) result; no wrapper-side slice needed.
            # TODO(synk): emit bf16 here if downstream tolerates it (halves write-back DMA).
            o_ref[...] = y[0:batch, 0:out_dim].astype(o_ref.dtype)


def init_mlp_params(key, input_dim, hidden_dims, n_layers, out_dim):
    """Deterministic init mimicking PyTorch nn.Linear default U(-1/sqrt(fan_in), +...).
    Weights stored pre-transposed [in, out] so the kernel computes x @ W + b."""
    assert len(hidden_dims) == n_layers, "hidden_dims must have exactly n_layers entries"
    dims = [input_dim] + list(hidden_dims) + [out_dim]
    params = []
    for i in range(len(dims) - 1):
        fan_in, fan_out = dims[i], dims[i + 1]
        key, kw, kb = jax.random.split(key, 3)
        bound = 1.0 / jnp.sqrt(jnp.float32(fan_in))
        w_t = jax.random.uniform(kw, (fan_in, fan_out), jnp.float32, -bound, bound)
        b = jax.random.uniform(kb, (fan_out,), jnp.float32, -bound, bound)
        params.append((w_t, b))
    return params


def pack_params(params):
    """One-time packing (off the hot path): weights -> bf16 zero-padded to 128-multiples on
    both axes; biases -> f32 (1, out_pad) so every operand is a clean lane-aligned block."""
    packed = []
    for w_t, b in params:
        fan_in, fan_out = w_t.shape
        in_pad = _round_up(fan_in, _LANE)
        out_pad = _round_up(fan_out, _LANE)
        w_pad = jnp.zeros((in_pad, out_pad), jnp.bfloat16)
        w_pad = w_pad.at[:fan_in, :fan_out].set(w_t.astype(jnp.bfloat16))
        b_pad = jnp.zeros((1, out_pad), jnp.float32)
        b_pad = b_pad.at[:, :fan_out].set(b)
        packed.append((w_pad, b_pad))
    return packed


def mlp_forward(x, packed_params, out_dim):
    """x: [B, C, H, W] (NCHW); flattened row-major like torch's .view(B, -1)."""
    B = x.shape[0]
    h = x.reshape(B, -1)                              # free under jit (layout-preserving)
    in_dim = h.shape[1]

    in_pad = packed_params[0][0].shape[0]
    n_linear = len(packed_params)
    B_pad = _round_up(max(B, _SUBLANE_BF16), _SUBLANE_BF16)

    flat_args = [h]
    for w_pad, b_pad in packed_params:
        flat_args.append(w_pad)
        flat_args.append(b_pad)

    # Advisory cost estimate: the kernel is launch/DMA-latency bound, let XLA know it's tiny.
    flops = 0
    bytes_accessed = h.size * h.dtype.itemsize + B * out_dim * 4
    for w_pad, b_pad in packed_params:
        flops += 2 * B_pad * w_pad.shape[0] * w_pad.shape[1]
        bytes_accessed += (w_pad.size * w_pad.dtype.itemsize
                           + b_pad.size * b_pad.dtype.itemsize)

    kernel = functools.partial(
        _fused_mlp_kernel, n_linear=n_linear, batch=B, in_dim=in_dim, out_dim=out_dim)

    return pl.pallas_call(
        kernel,
        out_shape=jax.ShapeDtypeStruct((B, out_dim), jnp.float32),
        in_specs=[pl.BlockSpec(memory_space=pltpu.MemorySpace.VMEM)] * len(flat_args),
        out_specs=pl.BlockSpec(memory_space=pltpu.MemorySpace.VMEM),
        scratch_shapes=[pltpu.VMEM((B_pad, in_pad), jnp.float32)],
        cost_estimate=pl.CostEstimate(
            flops=flops, transcendentals=0, bytes_accessed=bytes_accessed),
    )(*flat_args)


if __name__ == "__main__":
    key = jax.random.PRNGKey(0)
    k_x, k_p = jax.random.split(key)

    # Small shapes consistent with the module: batch=2, channels=4, spatial=4x4.
    B, C, H, W = 2, 4, 4, 4
    input_dim = C * H * W              # 64
    hidden_dims = [32, 32]
    n_layers = 2
    out_dim = 8
    dropout = 0.1                      # inference: identity

    x = jax.random.normal(k_x, (B, C, H, W), jnp.float32)
    params = init_mlp_params(k_p, input_dim, hidden_dims, n_layers, out_dim)
    packed = pack_params(params)

    fwd = jax.jit(mlp_forward, static_argnums=(2,))
    y = fwd(x, packed, out_dim)
    jax.block_until_ready(y)
    assert y.shape == (B, out_dim)

    # Reference in plain JAX with the same bf16-input / f32-accumulate numerics.
    h_ref = x.reshape(B, -1).astype(jnp.bfloat16).astype(jnp.float32)
    for i, (w_t, b) in enumerate(params):
        w_bf = w_t.astype(jnp.bfloat16).astype(jnp.float32)
        h_ref = jnp.dot(h_ref, w_bf, precision=jax.lax.Precision.HIGHEST) + b
        if i != len(params) - 1:
            h_ref = jnp.maximum(h_ref, 0.0)
            h_ref = h_ref.astype(jnp.bfloat16).astype(jnp.float32)

    assert jnp.allclose(y, h_ref, atol=1e-3, rtol=1e-3), (
        f"max abs diff = {jnp.max(jnp.abs(y - h_ref))}")

    print("KERNEL_OK")
</pallas_src>

<mosaic_0001>
module attributes {stable_mosaic.version = 11 : i64} {
  func.func @_fused_mlp_kernel(%arg0: memref<2x64xf32, #tpu.memory_space<vmem>>, %arg1: memref<128x128xbf16, #tpu.memory_space<vmem>>, %arg2: memref<1x128xf32, #tpu.memory_space<vmem>>, %arg3: memref<128x128xbf16, #tpu.memory_space<vmem>>, %arg4: memref<1x128xf32, #tpu.memory_space<vmem>>, %arg5: memref<128x128xbf16, #tpu.memory_space<vmem>>, %arg6: memref<1x128xf32, #tpu.memory_space<vmem>>, %arg7: memref<2x8xf32, #tpu.memory_space<vmem>>, %arg8: memref<16x128xf32, #tpu.memory_space<vmem>>) attributes {dimension_semantics = [], scalar_prefetch = 0 : i64, scratch_operands = 1 : i64, tpu.core_type = #tpu.core_type<tc>} {
    %cst = arith.constant 0.000000e+00 : f32
    %0 = vector.broadcast %cst : f32 to vector<16x128xf32>
    %c0 = arith.constant 0 : index
    %c0_0 = arith.constant 0 : index
    %1 = vector.load %arg8[%c0, %c0_0] : memref<16x128xf32, #tpu.memory_space<vmem>>, vector<16x128xf32>
    tpu.vector_store %arg8[%c0, %c0_0], %0 {strides = array<i32>} : memref<16x128xf32, #tpu.memory_space<vmem>>, vector<16x128xf32>,
    %c0_1 = arith.constant 0 : index
    %c0_2 = arith.constant 0 : index
    %2 = vector.load %arg0[%c0_1, %c0_2] : memref<2x64xf32, #tpu.memory_space<vmem>>, vector<2x64xf32>
    %c0_3 = arith.constant 0 : index
    %c0_4 = arith.constant 0 : index
    %3 = vector.load %arg8[%c0_3, %c0_4] : memref<16x128xf32, #tpu.memory_space<vmem>>, vector<2x64xf32>
    tpu.vector_store %arg8[%c0_3, %c0_4], %2 {strides = array<i32>} : memref<16x128xf32, #tpu.memory_space<vmem>>, vector<2x64xf32>,
    %c0_5 = arith.constant 0 : index
    %c0_6 = arith.constant 0 : index
    %4 = vector.load %arg8[%c0_5, %c0_6] : memref<16x128xf32, #tpu.memory_space<vmem>>, vector<16x128xf32>
    %5 = arith.truncf %4 : vector<16x128xf32> to vector<16x128xbf16>
    %c0_7 = arith.constant 0 : index
    %c0_8 = arith.constant 0 : index
    %6 = vector.load %arg1[%c0_7, %c0_8] : memref<128x128xbf16, #tpu.memory_space<vmem>>, vector<128x128xbf16>
    %c0_9 = arith.constant 0 : index
    %c0_10 = arith.constant 0 : index
    %7 = vector.load %arg2[%c0_9, %c0_10] : memref<1x128xf32, #tpu.memory_space<vmem>>, vector<1x128xf32>
    %cst_11 = arith.constant dense<0.000000e+00> : vector<16x128xf32>
    %8 = tpu.matmul %5, %6, %cst_11 {dimension_numbers = #tpu.dot_dimension_numbers<[1], [0], [0], [1], [0, 0, 1, 1], [], []>} : vector<16x128xbf16>, vector<128x128xbf16>, vector<16x128xf32> -> vector<16x128xf32>
    %9 = vector.broadcast %7 : vector<1x128xf32> to vector<16x128xf32>
    %10 = arith.addf %8, %9 : vector<16x128xf32>
    %cst_12 = arith.constant 0.000000e+00 : f32
    %11 = vector.broadcast %cst_12 : f32 to vector<16x128xf32>
    %12 = arith.maximumf %10, %11 : vector<16x128xf32>
    %13 = arith.truncf %12 : vector<16x128xf32> to vector<16x128xbf16>
    %c0_13 = arith.constant 0 : index
    %c0_14 = arith.constant 0 : index
    %14 = vector.load %arg3[%c0_13, %c0_14] : memref<128x128xbf16, #tpu.memory_space<vmem>>, vector<128x128xbf16>
    %c0_15 = arith.constant 0 : index
    %c0_16 = arith.constant 0 : index
    %15 = vector.load %arg4[%c0_15, %c0_16] : memref<1x128xf32, #tpu.memory_space<vmem>>, vector<1x128xf32>
    %cst_17 = arith.constant dense<0.000000e+00> : vector<16x128xf32>
    %16 = tpu.matmul %13, %14, %cst_17 {dimension_numbers = #tpu.dot_dimension_numbers<[1], [0], [0], [1], [0, 0, 1, 1], [], []>} : vector<16x128xbf16>, vector<128x128xbf16>, vector<16x128xf32> -> vector<16x128xf32>
    %17 = vector.broadcast %15 : vector<1x128xf32> to vector<16x128xf32>
    %18 = arith.addf %16, %17 : vector<16x128xf32>
    %cst_18 = arith.constant 0.000000e+00 : f32
    %19 = vector.broadcast %cst_18 : f32 to vector<16x128xf32>
    %20 = arith.maximumf %18, %19 : vector<16x128xf32>
    %21 = arith.truncf %20 : vector<16x128xf32> to vector<16x128xbf16>
    %c0_19 = arith.constant 0 : index
    %c0_20 = arith.constant 0 : index
    %22 = vector.load %arg5[%c0_19, %c0_20] : memref<128x128xbf16, #tpu.memory_space<vmem>>, vector<128x128xbf16>
    %c0_21 = arith.constant 0 : index
    %c0_22 = arith.constant 0 : index
    %23 = vector.load %arg6[%c0_21, %c0_22] : memref<1x128xf32, #tpu.memory_space<vmem>>, vector<1x128xf32>
    %cst_23 = arith.constant dense<0.000000e+00> : vector<16x128xf32>
    %24 = tpu.matmul %21, %22, %cst_23 {dimension_numbers = #tpu.dot_dimension_numbers<[1], [0], [0], [1], [0, 0, 1, 1], [], []>} : vector<16x128xbf16>, vector<128x128xbf16>, vector<16x128xf32> -> vector<16x128xf32>
    %25 = vector.broadcast %23 : vector<1x128xf32> to vector<16x128xf32>
    %26 = arith.addf %24, %25 : vector<16x128xf32>
    %27 = vector.extract_strided_slice %26 {offsets = [0, 0], sizes = [2, 8], strides = [1, 1]} : vector<16x128xf32> to vector<2x8xf32>
    %c0_24 = arith.constant 0 : index
    %c0_25 = arith.constant 0 : index
    %28 = vector.load %arg7[%c0_24, %c0_25] : memref<2x8xf32, #tpu.memory_space<vmem>>, vector<2x8xf32>
    tpu.vector_store %arg7[%c0_24, %c0_25], %27 {strides = array<i32>} : memref<2x8xf32, #tpu.memory_space<vmem>>, vector<2x8xf32>,
    return
  }
}

</mosaic_0001>

<bundles_post_ra>
// kernel: mlp_forward.1
= control target key start
LH: loop header
LB: loop body
LE: loop exit
PB: predicated region body
PF: predicated region fallthrough
CT: control target
= control target key end

     0   :  { %12 = vsyncpa [#allocation4], 0  ;;  %s772_s0 = inlined_call_operand.vmem [shape: f32[2,64], index: 0, kind: input, shape index: {}]   ;;  %s773_s1 = inlined_call_operand.hbm [shape: bf16[128,128], index: 1, kind: input, shape index: {}]   ;;  %s774_s2 = inlined_call_operand.vmem [shape: f32[1,128], index: 2, kind: input, shape index: {}]   ;;  %s775_s3 = inlined_call_operand.hbm [shape: bf16[128,128], index: 3, kind: input, shape index: {}]   ;;  %s776_s4 = inlined_call_operand.vmem [shape: f32[1,128], index: 4, kind: input, shape index: {}]   ;;  %s777_s5 = inlined_call_operand.hbm [shape: bf16[128,128], index: 5, kind: input, shape index: {}]   ;;  %s778_s6 = inlined_call_operand.vmem [shape: f32[1,128], index: 6, kind: input, shape index: {}]   ;;  %s779_s7 = inlined_call_operand.hbm [shape: f32[2,8], index: 7, kind: output, shape index: {}]  }
   0x1   :  { %13 = vsyncpa [#allocation7], 0 }
   0x2   :  { %14 = vsyncpa [#allocation5], 0  ;;  %s668_s24 = smov [#allocation6]   ;;  %s669_s26 = smov [#allocation3]  }
   0x3   :  { %s36_s25 = sshll.u32 %s668_s24, 4  ;;  %s22_s27 = sshll.u32 %s669_s26, 4  ;;  %s37_s25 = int_to_ptr.vmem [resolvable:$true] %s36_s25  ;;  %s23_s27 = int_to_ptr.vmem [resolvable:$true] %s22_s27 }
   0x4   :  { %s590_s28 = scalar_lea.vmem %s37_s25, 1024  ;;  %p595_p1 = scmp.lt.s32.totalorder %s37_s25, %s37_s25 }
   0x5   :  { %p591_p0 = scmp.ne.s32.totalorder %s37_s25, %s590_s28  ;;  %p596_p2 = scmp.lt.s32.totalorder %s590_s28, %s590_s28 }
   0x7   :  { %p597_p3 = por %p596_p2, %p595_p1 }
   0x9   :  { %p598_p4 = pnand %p597_p3, %p591_p0 }
   0xb   :  { %601 = shalt.err (!%p598_p4)
}
   0xc   :  { %s670_s29 = smov 64   ;;  %s671_s30 = smov 4  }
   0xd   :  { %42 = dma.hbm_to_vmem [thread:$0]  %s775_s3, 1024, %s37_s25, [#allocation7], %s670_s29, %s670_s29, %s671_s30  }
   0xe   :  { %s610_s10 = scalar_lea.vmem %s23_s27, 1024  ;;  %p615_p6 = scmp.lt.s32.totalorder %s23_s27, %s23_s27 }
   0xf   :  { %p611_p5 = scmp.ne.s32.totalorder %s23_s27, %s610_s10  ;;  %p616_p7 = scmp.lt.s32.totalorder %s610_s10, %s610_s10 }
  0x11   :  { %p617_p8 = por %p616_p7, %p615_p6 }
  0x13   :  { %p618_p9 = pnand %p617_p8, %p611_p5 }
  0x15   :  { %621 = shalt.err (!%p618_p9)
}
  0x16   :  { %28 = dma.hbm_to_vmem [thread:$0]  %s773_s1, 1024, %s23_s27, [#allocation4], %s670_s29, %s670_s29, %s671_s30  }
  0x17   :  { %s672_s13 = smov [#allocation8]  }
  0x18   :  { %s50_s14 = sshll.u32 %s672_s13, 4  ;;  %s51_s14 = int_to_ptr.vmem [resolvable:$true] %s50_s14 }
  0x19   :  { %s630_s15 = scalar_lea.vmem %s51_s14, 1024  ;;  %p635_p11 = scmp.lt.s32.totalorder %s51_s14, %s51_s14 }
  0x1a   :  { %p631_p10 = scmp.ne.s32.totalorder %s51_s14, %s630_s15  ;;  %p636_p12 = scmp.lt.s32.totalorder %s630_s15, %s630_s15 }
  0x1c   :  { %p637_p13 = por %p636_p12, %p635_p11 }
  0x1e   :  { %p638_p0 = pnand %p637_p13, %p631_p10 }
  0x20   :  { %641 = shalt.err (!%p638_p0)
}
  0x21   :  { %56 = dma.hbm_to_vmem [thread:$0]  %s777_s5, 1024, %s51_s14, [#allocation7], %s670_s29, %s670_s29, %s671_s30  }
  0x22   :  { %662 = dma.done.wait [#allocation4], 1024  }
  0x23   :  { %663 = vsyncadd [#allocation4], 4294966272 }
  0x24   :  { %664 = dma.done.wait [#allocation7], 2048  }
  0x25   :  { %665 = vsyncadd [#allocation7], 4294965248  ;;  %v673_v0 = vmov 0.0   ;;  %vm674_vm0 = vmmov 0   ;;  %v558_v1 = vld [vmem:[#allocation3 + $0x38] sm:$0xff]   ;;  %v559_v2 = vld [vmem:[#allocation3 + $0x30] sm:$0xff]  }
  0x26   :  { %490 = vmatprep.subr.bf16.mxu0 %v673_v0  ;;  %69 = vst [vmem:[#allocation2] sm:$0xff] %v673_v0  ;;  %506 = vmatprep.mubr.msk.bf16.mxu0 %vm674_vm0, %v673_v0  ;;  %v560_v3 = vld [vmem:[#allocation3 + $0x28] sm:$0xff]   ;;  %vm72_vm1 = vcmask 517120   ;;  %v71_v4 = vld [vmem:[%s772_s0] sm:$0x3]  ;;  %v566_v5 = vld [vmem:[#allocation6 + $0x38] sm:$0xff]  }
  0x27   :  { %510 = vmatprep.subr.bf16.mxu1 %v673_v0  ;;  %526 = vmatprep.mubr.msk.bf16.mxu1 %vm674_vm0, %v673_v0  ;;  %73 = vst.msk [vmem:[#allocation2] sm:$0x3] %vm72_vm1, %v71_v4  ;;  %v561_v6 = vld [vmem:[#allocation3 + $0x20] sm:$0xff]   ;;  %v567_v7 = vld [vmem:[#allocation6 + $0x30] sm:$0xff]   ;;  %v562_v8 = vld [vmem:[#allocation3 + $0x18] sm:$0xff]   ;;  %s675_s21 = smov [#allocation9]  }
  0x28   :  { %491 = vmatpush3.bf16.msra.mxu0 %v558_v1  ;;  %511 = vmatpush3.bf16.msra.mxu1 %v566_v5  ;;  %v568_v9 = vld [vmem:[#allocation6 + $0x28] sm:$0xff]   ;;  %v563_v10 = vld [vmem:[#allocation3 + $0x10] sm:$0xff]   ;;  %v569_v11 = vld [vmem:[#allocation6 + $0x20] sm:$0xff]   ;;  %s426_s22 = sshll.u32 %s675_s21, 4  ;;  %vm418_vm2 = vcmask 58368   ;;  %s427_s22 = int_to_ptr.vmem [resolvable:$true] %s426_s22 }
  0x29   :  { %492 = vmatprep.subr.bf16.mxu0 %v673_v0  ;;  %512 = vmatprep.subr.bf16.mxu1 %v673_v0  ;;  %v564_v12 = vld [vmem:[#allocation3 + $0x8] sm:$0xff]   ;;  %v570_v13 = vld [vmem:[#allocation6 + $0x18] sm:$0xff]   ;;  %v565_v14 = vld [vmem:[#allocation3] sm:$0xff]   ;;  %p647_p2 = scmp.lt.s32.totalorder %s427_s22, %s427_s22 }
  0x2a   :  { %v571_v17 = vld [vmem:[#allocation6 + $0x10] sm:$0xff]   ;;  %v572_v18 = vld [vmem:[#allocation6 + $0x8] sm:$0xff]   ;;  %v573_v19 = vld [vmem:[#allocation6] sm:$0xff]  }
  0x2b   :  { %v574_v20 = vld [vmem:[#allocation8 + $0x38] sm:$0xff]   ;;  %v575_v21 = vld [vmem:[#allocation8 + $0x30] sm:$0xff]   ;;  %v576_v22 = vld [vmem:[#allocation8 + $0x28] sm:$0xff]  }
  0x2c   :  { %493 = vmatpush3.bf16.msra.mxu0 %v559_v2  ;;  %513 = vmatpush3.bf16.msra.mxu1 %v567_v7  ;;  %v577_v23 = vld [vmem:[#allocation8 + $0x20] sm:$0xff]   ;;  %v578_v24 = vld [vmem:[#allocation8 + $0x18] sm:$0xff]   ;;  %v436_v25 = vld [vmem:[%s774_s2] ss:$0 sm:$0xff] }
  0x2d   :  { %494 = vmatprep.subr.bf16.mxu0 %v673_v0  ;;  %514 = vmatprep.subr.bf16.mxu1 %v673_v0  ;;  %v579_v35 = vld [vmem:[#allocation8 + $0x10] sm:$0xff]   ;;  %v580_v36 = vld [vmem:[#allocation8 + $0x8] sm:$0xff]   ;;  %v581_v37 = vld [vmem:[#allocation8] sm:$0xff]  }
  0x2e   :  { %v74_v15 = vld [vmem:[#allocation2] sm:$0xff] }
  0x2f   :  { %v76_v16 = vpack.c.bf16 %v673_v0, %v74_v15  ;;  %v445_v38 = vld [vmem:[%s776_s4] ss:$0 sm:$0xff]  ;;  %s642_s4 = scalar_lea.vmem %s427_s22, 32 }
  0x30   :  { %495 = vmatpush3.bf16.msra.mxu0 %v560_v3  ;;  %515 = vmatpush3.bf16.msra.mxu1 %v568_v9  ;;  %v454_v48 = vld [vmem:[%s778_s6] ss:$0 sm:$0xff]  ;;  %p643_p1 = scmp.ne.s32.totalorder %s427_s22, %s642_s4  ;;  %p648_p3 = scmp.lt.s32.totalorder %s642_s4, %s642_s4 }
  0x31   :  { %496 = vmatprep.subr.bf16.mxu0 %v673_v0  ;;  %516 = vmatprep.subr.bf16.mxu1 %v673_v0 }
  0x32   :  { %p649_p4 = por %p648_p3, %p647_p2 }
  0x34   :  { %497 = vmatpush3.bf16.msra.mxu0 %v561_v6  ;;  %517 = vmatpush3.bf16.msra.mxu1 %v569_v11  ;;  %p650_p5 = pnand %p649_p4, %p643_p1 }
  0x35   :  { %498 = vmatprep.subr.bf16.mxu0 %v673_v0  ;;  %518 = vmatprep.subr.bf16.mxu1 %v673_v0 }
  0x38   :  { %499 = vmatpush3.bf16.msra.mxu0 %v562_v8  ;;  %519 = vmatpush3.bf16.msra.mxu1 %v570_v13 }
  0x39   :  { %500 = vmatprep.subr.bf16.mxu0 %v673_v0  ;;  %520 = vmatprep.subr.bf16.mxu1 %v673_v0 }
  0x3c   :  { %501 = vmatpush3.bf16.msra.mxu0 %v563_v10  ;;  %521 = vmatpush3.bf16.msra.mxu1 %v571_v17 }
  0x3d   :  { %502 = vmatprep.subr.bf16.mxu0 %v673_v0  ;;  %522 = vmatprep.subr.bf16.mxu1 %v673_v0 }
  0x40   :  { %503 = vmatpush3.bf16.msra.mxu0 %v564_v12  ;;  %523 = vmatpush3.bf16.msra.mxu1 %v572_v18 }
  0x41   :  { %504 = vmatprep.subr.bf16.mxu0 %v673_v0  ;;  %524 = vmatprep.subr.bf16.mxu1 %v673_v0 }
  0x44   :  { %505 = vmatpush3.bf16.msra.mxu0 %v565_v14  ;;  %525 = vmatpush3.bf16.msra.mxu1 %v573_v19 }
  0x45   :  { %530 = vmatprep.subr.bf16.mxu0 %v673_v0 }
  0x47   :  { %507 = vmatmul.mubr.bf16.vlgmr.msra.gmra.mxu0 %v76_v16 }
  0x48   :  { %546 = vmatprep.mubr.msk.bf16.mxu0 %vm674_vm0, %v673_v0  ;;  %531 = vmatpush3.bf16.msra.mxu0 %v574_v20 }
  0x49   :  { %532 = vmatprep.subr.bf16.mxu0 %v673_v0 }
  0x4c   :  { %533 = vmatpush3.bf16.msra.mxu0 %v575_v21 }
  0x4d   :  { %534 = vmatprep.subr.bf16.mxu0 %v673_v0 }
  0x50   :  { %535 = vmatpush3.bf16.msra.mxu0 %v576_v22 }
  0x51   :  { %536 = vmatprep.subr.bf16.mxu0 %v673_v0 }
  0x54   :  { %537 = vmatpush3.bf16.msra.mxu0 %v577_v23 }
  0x55   :  { %538 = vmatprep.subr.bf16.mxu0 %v673_v0 }
  0x58   :  { %539 = vmatpush3.bf16.msra.mxu0 %v578_v24 }
  0x59   :  { %540 = vmatprep.subr.bf16.mxu0 %v673_v0 }
  0x5c   :  { %541 = vmatpush3.bf16.msra.mxu0 %v579_v35 }
  0x5d   :  { %542 = vmatprep.subr.bf16.mxu0 %v673_v0 }
  0x60   :  { %543 = vmatpush3.bf16.msra.mxu0 %v580_v36 }
  0x61   :  { %544 = vmatprep.subr.bf16.mxu0 %v673_v0 }
  0x64   :  { %545 = vmatpush3.bf16.msra.mxu0 %v581_v37 }
 0x107   :  { %v182_v26 = vpop.f32.mrf.mxu0 }
 0x108   :  { %v183_v28 = vadd.f32 %v436_v25, %v182_v26 }
 0x109   :  { %v508_v27 = vpop.f32.mrf.mxu0 }
 0x10a   :  { %v189_v32 = vmax.f32 %v183_v28, 0.0 }
 0x10b   :  { %v185_v29 = vpop.f32.mrf.mxu0 }
 0x10c   :  { %v186_v30 = vadd.f32 %v436_v25, %v185_v29 }
 0x10d   :  { %v509_v31 = vpop.f32.mrf.mxu0 }
 0x10e   :  { %v190_v33 = vmax.f32 %v186_v30, 0.0 }
 0x110   :  { %v191_v34 = vpack.c.bf16 %v190_v33, %v189_v32 }
 0x112   :  { %527 = vmatmul.mubr.bf16.vlgmr.msra.gmra.mxu1 %v191_v34 }
 0x1d2   :  { %v297_v39 = vpop.f32.mrf.mxu1 }
 0x1d3   :  { %v298_v41 = vadd.f32 %v445_v38, %v297_v39 }
 0x1d4   :  { %v528_v40 = vpop.f32.mrf.mxu1 }
 0x1d5   :  { %v304_v45 = vmax.f32 %v298_v41, 0.0 }
 0x1d6   :  { %v300_v42 = vpop.f32.mrf.mxu1 }
 0x1d7   :  { %v301_v43 = vadd.f32 %v445_v38, %v300_v42 }
 0x1d8   :  { %v529_v44 = vpop.f32.mrf.mxu1 }
 0x1d9   :  { %v305_v46 = vmax.f32 %v301_v43, 0.0 }
 0x1db   :  { %v306_v47 = vpack.c.bf16 %v305_v46, %v304_v45 }
 0x1dd   :  { %547 = vmatmul.mubr.bf16.vlgmr.msra.gmra.mxu0 %v306_v47 }
 0x29d   :  { %v412_v49 = vpop.f32.mrf.mxu0 }
 0x29e   :  { %v413_v50 = vadd.f32 %v454_v48, %v412_v49 }
 0x29f   :  { %v548_v51 = vpop.f32.mrf.mxu0 }
 0x2a0   :  { %419 = vst.msk [vmem:[#allocation9] sm:$0x3] %vm418_vm2, %v413_v50 }
 0x2a1   :  { %v415_v52 = vpop.f32.mrf.mxu0 }
 0x2a2   :  { %653 = shalt.err (!%p650_p5)
}
 0x2a3   :  { %429 = dma.vmem_to_hbm [thread:$0]  %s427_s22, 32, %s779_s7, [#allocation5]   ;;  %v549_v53 = vpop.f32.mrf.mxu0 }
 0x2a4   :  { %666 = dma.done.wait [#allocation5], 32  }
 0x2a5   :  { %667 = vsyncadd [#allocation5], 4294967264 }
 0x2a6   :  { %433 = vsyncpa [#allocation4], 1 }
 0x2a7   :  { %434 = vsyncpa [#allocation7], 1 }
 0x2a8   :  { %435 = vsyncpa [#allocation5], 1 }

</bundles_post_ra>
